<compile_context>
chip_gen: v7x
topology: tpu7x:2x2x1
jax: 0.10.0
libtpu: 0.0.40
codegen_flags: <defaults>
</compile_context>

<pallas_src>
import functools

import jax
import jax.numpy as jnp
import numpy as np
from jax.experimental import pallas as pl
from jax.experimental.pallas import tpu as pltpu


def _fused_stem_kernel(p_ref, w_ref, shift_ref, o_ref, carry_ref, *, PB, W2c, C):
    # p_ref:     (PB, 4*W2c, K) bf16 im2col rows, ordered (q, hpar, wpar, w2)
    #            where conv row = 2*(j*PB + q) + hpar and conv col = 2*w2 + wpar.
    # w_ref:     (K, C) bf16 conv weight with BN scale folded in (VMEM resident).
    # shift_ref: (1, C) f32 BN shift.
    # o_ref:     (PB, W2c, C) f32 pooled output rows for this band.
    # carry_ref: (W2c, C) f32 scratch: W-pooled last conv row of the previous band.
    j = pl.program_id(1)

    @pl.when(j == 0)
    def _():
        carry_ref[...] = jnp.zeros_like(carry_ref)

    K = p_ref.shape[-1]
    rows = PB * 4 * W2c

    # conv as one big MXU matmul (f32 accumulation), BN shift + ReLU epilogue in f32
    x = p_ref[...].reshape(rows, K)
    acc = jnp.dot(x, w_ref[...], preferred_element_type=jnp.float32)
    y = jnp.maximum(acc + shift_ref[...], 0.0)

    # ---- maxpool 3x3 stride 2 pad 1 (separable; 0-padding valid post-ReLU) ----
    # W direction: cols {2*w2-1, 2*w2, 2*w2+1}
    z = y.reshape(2 * PB, 2, W2c, C)            # (2q+hp, wp, w2, c)
    even_w = z[:, 0]                            # conv col 2*w2
    odd_w = z[:, 1]                             # conv col 2*w2+1
    left_w = jnp.concatenate(
        [jnp.zeros((2 * PB, 1, C), jnp.float32), odd_w[:, :W2c - 1, :]], axis=1)
    yw = jnp.maximum(jnp.maximum(even_w, odd_w), left_w)   # (2PB, W2c, C)

    # H direction: rows {2q-1 (carry / previous odd row), 2q, 2q+1}
    yw = yw.reshape(PB, 2, W2c, C)
    yh_even = yw[:, 0]                          # conv row 2q   (W-pooled)
    yh_odd = yw[:, 1]                           # conv row 2q+1 (W-pooled)
    if PB > 1:
        prev = jnp.concatenate([carry_ref[...][None], yh_odd[:PB - 1]], axis=0)
    else:
        prev = carry_ref[...][None]
    o_ref[...] = jnp.maximum(jnp.maximum(yh_even, yh_odd), prev)

    # carry the last (odd) W-pooled conv row of this band to the next band
    carry_ref[...] = yh_odd[PB - 1]


@jax.jit
def basic_stem_forward(x_nchw, weight, gamma, beta, running_mean, running_var,
                       eps=1e-5):
    N, Cin, H, W = x_nchw.shape
    Cout, _, KH, KW = weight.shape
    stride, pad = 2, 3
    Ho = (H + 2 * pad - KH) // stride + 1
    Wo = (W + 2 * pad - KW) // stride + 1
    Ho2 = (Ho + 2 - 3) // 2 + 1
    Wo2 = (Wo + 2 - 3) // 2 + 1
    K = KH * KW * Cin

    # pooled-column count padded to a sublane multiple; pooled rows per band
    W2c = -(-Wo2 // 8) * 8
    PB = min(8, Ho2)
    while PB > 1 and PB * 4 * W2c * 256 * 2 > 3 * 2 ** 20:   # cap per-band VMEM
        PB //= 2
    Ho2_pad = -(-Ho2 // PB) * PB
    nbands = Ho2_pad // PB
    Ho_need, Wo_need = 2 * Ho2_pad, 2 * W2c

    # ---- glue (XLA): im2col in NHWC, bf16, pool-friendly row ordering ----
    x = jnp.transpose(x_nchw, (0, 2, 3, 1)).astype(jnp.float32)     # NHWC
    xp = jnp.pad(x, ((0, 0), (pad, pad), (pad, pad), (0, 0)))
    taps = []
    for kh in range(KH):
        for kw in range(KW):
            taps.append(xp[:, kh:kh + stride * Ho:stride,
                           kw:kw + stride * Wo:stride, :])
    patches = jnp.stack(taps, axis=3).reshape(N, Ho, Wo, K).astype(jnp.bfloat16)
    # edge-replicate ragged conv rows/cols: max-pool invariant (post-ReLU >= 0)
    patches = jnp.pad(
        patches, ((0, 0), (0, Ho_need - Ho), (0, Wo_need - Wo), (0, 0)),
        mode="edge")
    # (N, 2q+hp, 2*w2+wp, K) -> (N, q, hp, wp, w2, K) -> (N, q, 4*W2c, K)
    patches = patches.reshape(N, Ho2_pad, 2, W2c, 2, K)
    patches = jnp.transpose(patches, (0, 1, 2, 4, 3, 5))
    patches = patches.reshape(N, Ho2_pad, 4 * W2c, K)

    # fold FrozenBatchNorm scale into the conv weight; keep shift in f32
    scale = gamma / jnp.sqrt(running_var + eps)
    shift = (beta - running_mean * scale).reshape(1, Cout).astype(jnp.float32)
    w_mat = jnp.transpose(weight, (2, 3, 1, 0)).reshape(K, Cout).astype(jnp.float32)
    w_mat = (w_mat * scale[None, :]).astype(jnp.bfloat16)

    out = pl.pallas_call(
        functools.partial(_fused_stem_kernel, PB=PB, W2c=W2c, C=Cout),
        out_shape=jax.ShapeDtypeStruct((N, Ho2_pad, W2c, Cout), jnp.float32),
        grid_spec=pltpu.PrefetchScalarGridSpec(
            num_scalar_prefetch=0,
            grid=(N, nbands),
            in_specs=[
                pl.BlockSpec((None, PB, 4 * W2c, K), lambda n, j: (n, j, 0, 0)),
                pl.BlockSpec((K, Cout), lambda n, j: (0, 0)),
                pl.BlockSpec((1, Cout), lambda n, j: (0, 0)),
            ],
            out_specs=pl.BlockSpec((None, PB, W2c, Cout),
                                   lambda n, j: (n, j, 0, 0)),
            scratch_shapes=[pltpu.VMEM((W2c, Cout), jnp.float32)],
        ),
        compiler_params=pltpu.CompilerParams(
            dimension_semantics=("parallel", "arbitrary"),
            vmem_limit_bytes=32 * 1024 * 1024),
    )(patches, w_mat, shift)

    out = out[:, :Ho2, :Wo2, :]                 # drop padded pooled rows/cols
    return jnp.transpose(out, (0, 3, 1, 2))     # back to NCHW


def basic_stem_reference(x_nchw, weight, gamma, beta, running_mean, running_var,
                         eps=1e-5, bf16_operands=False):
    # Pure-JAX reference (lax conv + BN + ReLU + reduce_window maxpool), NHWC.
    x = jnp.transpose(x_nchw, (0, 2, 3, 1)).astype(jnp.float32)
    w = jnp.transpose(weight, (2, 3, 1, 0)).astype(jnp.float32)     # HWIO
    scale = gamma / jnp.sqrt(running_var + eps)
    shift = beta - running_mean * scale
    if bf16_operands:
        # mirror the kernel's bf16 MXU feed (scale folded into the weight)
        x = x.astype(jnp.bfloat16).astype(jnp.float32)
        w = (w * scale).astype(jnp.bfloat16).astype(jnp.float32)
        y = jax.lax.conv_general_dilated(
            x, w, (2, 2), [(3, 3), (3, 3)],
            dimension_numbers=("NHWC", "HWIO", "NHWC"),
            precision=jax.lax.Precision.HIGHEST)
        y = y + shift
    else:
        y = jax.lax.conv_general_dilated(
            x, w, (2, 2), [(3, 3), (3, 3)],
            dimension_numbers=("NHWC", "HWIO", "NHWC"),
            precision=jax.lax.Precision.HIGHEST)
        y = y * scale + shift
    y = jnp.maximum(y, 0.0)
    y = jax.lax.reduce_window(
        y, -jnp.inf, jax.lax.max, window_dimensions=(1, 3, 3, 1),
        window_strides=(1, 2, 2, 1),
        padding=[(0, 0), (1, 1), (1, 1), (0, 0)])
    return jnp.transpose(y, (0, 3, 1, 2))


if __name__ == "__main__":
    key = jax.random.PRNGKey(0)
    k_x, k_w, k_g, k_b, k_m, k_v = jax.random.split(key, 6)

    N, Cin, H, W = 2, 3, 16, 16     # BasicStem default in_channels=3
    Cout, KH, KW = 64, 7, 7

    x = jax.random.normal(k_x, (N, Cin, H, W), jnp.float32)
    weight = jax.random.normal(k_w, (Cout, Cin, KH, KW), jnp.float32) * 0.1
    gamma = jax.random.uniform(k_g, (Cout,), jnp.float32, 0.5, 1.5)
    beta = jax.random.normal(k_b, (Cout,), jnp.float32) * 0.1
    running_mean = jax.random.normal(k_m, (Cout,), jnp.float32) * 0.1
    running_var = jax.random.uniform(k_v, (Cout,), jnp.float32, 0.5, 1.5)

    out = basic_stem_forward(x, weight, gamma, beta, running_mean, running_var)
    out = jax.block_until_ready(out)
    assert out.shape == (N, Cout, H // 4, W // 4), out.shape

    # tight check against a reference fed the same bf16-rounded operands
    ref_bf16 = basic_stem_reference(x, weight, gamma, beta, running_mean,
                                    running_var, bf16_operands=True)
    np.testing.assert_allclose(np.asarray(out), np.asarray(ref_bf16),
                               rtol=1e-3, atol=1e-3)
    # loose sanity check against the pure-f32 module semantics
    ref_f32 = basic_stem_reference(x, weight, gamma, beta, running_mean,
                                   running_var, bf16_operands=False)
    np.testing.assert_allclose(np.asarray(out), np.asarray(ref_f32),
                               rtol=1e-1, atol=1e-1)
    print("KERNEL_OK")
</pallas_src>

<mosaic_0001>
module attributes {stable_mosaic.version = 11 : i64} {
  func.func @_fused_stem_kernel(%arg0: i32, %arg1: i32, %arg2: memref<1x4x32x147xbf16, #tpu.memory_space<vmem>>, %arg3: memref<147x64xbf16, #tpu.memory_space<vmem>>, %arg4: memref<1x64xf32, #tpu.memory_space<vmem>>, %arg5: memref<1x4x8x64xf32, #tpu.memory_space<vmem>>, %arg6: memref<8x64xf32, #tpu.memory_space<vmem>>) attributes {dimension_semantics = [#tpu.dimension_semantics<parallel>, #tpu.dimension_semantics<arbitrary>], iteration_bounds = array<i64: 2, 1>, scalar_prefetch = 0 : i64, scratch_operands = 1 : i64, tpu.core_type = #tpu.core_type<tc>, window_params = [{transform_indices = @transform_0, window_bounds = array<i64: 1, 4, 32, 147>}, {pipeline_mode = #tpu.pipeline_mode<synchronous>, transform_indices = @transform_1, window_bounds = array<i64: 147, 64>}, {pipeline_mode = #tpu.pipeline_mode<synchronous>, transform_indices = @transform_2, window_bounds = array<i64: 1, 64>}, {transform_indices = @transform_3, window_bounds = array<i64: 1, 4, 8, 64>}]} {
    %c0_i32 = arith.constant 0 : i32
    %0 = arith.cmpi eq, %arg1, %c0_i32 : i32
    %1 = arith.extui %0 : i1 to i32
    %c0_i32_0 = arith.constant 0 : i32
    %2 = arith.cmpi ne, %1, %c0_i32_0 : i32
    scf.if %2 {
      %cst_18 = arith.constant 0.000000e+00 : f32
      %40 = vector.broadcast %cst_18 : f32 to vector<8x64xf32>
      %c0_19 = arith.constant 0 : index
      %c0_20 = arith.constant 0 : index
      %41 = vector.load %arg6[%c0_19, %c0_20] : memref<8x64xf32, #tpu.memory_space<vmem>>, vector<8x64xf32>
      tpu.vector_store %arg6[%c0_19, %c0_20], %40 {strides = array<i32>} : memref<8x64xf32, #tpu.memory_space<vmem>>, vector<8x64xf32>,
    } else {
    }
    %c0 = arith.constant 0 : index
    %c0_1 = arith.constant 0 : index
    %c0_2 = arith.constant 0 : index
    %c0_3 = arith.constant 0 : index
    %3 = vector.load %arg2[%c0, %c0_1, %c0_2, %c0_3] : memref<1x4x32x147xbf16, #tpu.memory_space<vmem>>, vector<1x4x32x147xbf16>
    %4 = vector.shape_cast %3 : vector<1x4x32x147xbf16> to vector<4x32x147xbf16>
    %5 = vector.shape_cast %4 : vector<4x32x147xbf16> to vector<128x147xbf16>
    %c0_4 = arith.constant 0 : index
    %c0_5 = arith.constant 0 : index
    %6 = vector.load %arg3[%c0_4, %c0_5] : memref<147x64xbf16, #tpu.memory_space<vmem>>, vector<147x64xbf16>
    %cst = arith.constant dense<0.000000e+00> : vector<128x64xf32>
    %7 = tpu.matmul %5, %6, %cst {dimension_numbers = #tpu.dot_dimension_numbers<[1], [0], [0], [1], [0, 0, 1, 1], [], []>} : vector<128x147xbf16>, vector<147x64xbf16>, vector<128x64xf32> -> vector<128x64xf32>
    %c0_6 = arith.constant 0 : index
    %c0_7 = arith.constant 0 : index
    %8 = vector.load %arg4[%c0_6, %c0_7] : memref<1x64xf32, #tpu.memory_space<vmem>>, vector<1x64xf32>
    %9 = vector.broadcast %8 : vector<1x64xf32> to vector<128x64xf32>
    %10 = arith.addf %7, %9 : vector<128x64xf32>
    %cst_8 = arith.constant 0.000000e+00 : f32
    %11 = vector.broadcast %cst_8 : f32 to vector<128x64xf32>
    %12 = arith.maximumf %10, %11 : vector<128x64xf32>
    %13 = vector.shape_cast %12 : vector<128x64xf32> to vector<8x2x8x64xf32>
    %14 = vector.extract_strided_slice %13 {offsets = [0, 0, 0, 0], sizes = [8, 1, 8, 64], strides = [1, 1, 1, 1]} : vector<8x2x8x64xf32> to vector<8x1x8x64xf32>
    %15 = vector.shape_cast %14 : vector<8x1x8x64xf32> to vector<8x8x64xf32>
    %16 = vector.extract_strided_slice %13 {offsets = [0, 1, 0, 0], sizes = [8, 1, 8, 64], strides = [1, 1, 1, 1]} : vector<8x2x8x64xf32> to vector<8x1x8x64xf32>
    %17 = vector.shape_cast %16 : vector<8x1x8x64xf32> to vector<8x8x64xf32>
    %cst_9 = arith.constant 0.000000e+00 : f32
    %18 = vector.broadcast %cst_9 : f32 to vector<8x1x64xf32>
    %19 = vector.extract_strided_slice %17 {offsets = [0, 0, 0], sizes = [8, 7, 64], strides = [1, 1, 1]} : vector<8x8x64xf32> to vector<8x7x64xf32>
    %20 = tpu.concatenate %18, %19 in 1 : vector<8x1x64xf32>, vector<8x7x64xf32> -> vector<8x8x64xf32>
    %21 = arith.maximumf %15, %17 : vector<8x8x64xf32>
    %22 = arith.maximumf %21, %20 : vector<8x8x64xf32>
    %23 = vector.shape_cast %22 : vector<8x8x64xf32> to vector<4x2x8x64xf32>
    %24 = vector.extract_strided_slice %23 {offsets = [0, 0, 0, 0], sizes = [4, 1, 8, 64], strides = [1, 1, 1, 1]} : vector<4x2x8x64xf32> to vector<4x1x8x64xf32>
    %25 = vector.shape_cast %24 : vector<4x1x8x64xf32> to vector<4x8x64xf32>
    %26 = vector.extract_strided_slice %23 {offsets = [0, 1, 0, 0], sizes = [4, 1, 8, 64], strides = [1, 1, 1, 1]} : vector<4x2x8x64xf32> to vector<4x1x8x64xf32>
    %27 = vector.shape_cast %26 : vector<4x1x8x64xf32> to vector<4x8x64xf32>
    %c0_10 = arith.constant 0 : index
    %c0_11 = arith.constant 0 : index
    %28 = vector.load %arg6[%c0_10, %c0_11] : memref<8x64xf32, #tpu.memory_space<vmem>>, vector<8x64xf32>
    %29 = vector.shape_cast %28 : vector<8x64xf32> to vector<1x8x64xf32>
    %30 = vector.extract_strided_slice %27 {offsets = [0, 0, 0], sizes = [3, 8, 64], strides = [1, 1, 1]} : vector<4x8x64xf32> to vector<3x8x64xf32>
    %31 = tpu.concatenate %29, %30 in 0 : vector<1x8x64xf32>, vector<3x8x64xf32> -> vector<4x8x64xf32>
    %32 = arith.maximumf %25, %27 : vector<4x8x64xf32>
    %33 = arith.maximumf %32, %31 : vector<4x8x64xf32>
    %c0_12 = arith.constant 0 : index
    %c0_13 = arith.constant 0 : index
    %c0_14 = arith.constant 0 : index
    %c0_15 = arith.constant 0 : index
    %34 = vector.load %arg5[%c0_12, %c0_13, %c0_14, %c0_15] : memref<1x4x8x64xf32, #tpu.memory_space<vmem>>, vector<1x4x8x64xf32>
    %35 = vector.shape_cast %34 : vector<1x4x8x64xf32> to vector<4x8x64xf32>
    %36 = vector.shape_cast %33 : vector<4x8x64xf32> to vector<1x4x8x64xf32>
    tpu.vector_store %arg5[%c0_12, %c0_13, %c0_14, %c0_15], %36 {strides = array<i32>} : memref<1x4x8x64xf32, #tpu.memory_space<vmem>>, vector<1x4x8x64xf32>,
    %37 = vector.extract_strided_slice %27 {offsets = [3, 0, 0], sizes = [1, 8, 64], strides = [1, 1, 1]} : vector<4x8x64xf32> to vector<1x8x64xf32>
    %38 = vector.shape_cast %37 : vector<1x8x64xf32> to vector<8x64xf32>
    %c0_16 = arith.constant 0 : index
    %c0_17 = arith.constant 0 : index
    %39 = vector.load %arg6[%c0_16, %c0_17] : memref<8x64xf32, #tpu.memory_space<vmem>>, vector<8x64xf32>
    tpu.vector_store %arg6[%c0_16, %c0_17], %38 {strides = array<i32>} : memref<8x64xf32, #tpu.memory_space<vmem>>, vector<8x64xf32>,
    return
  }
  func.func @transform_0(%arg0: i32, %arg1: i32) -> (i32, i32, i32, i32) {
    %c0_i32 = arith.constant 0 : i32
    %c0_i32_0 = arith.constant 0 : i32
    %c0_i32_1 = arith.constant 0 : i32
    return %arg0, %arg1, %c0_i32, %c0_i32_0 : i32, i32, i32, i32
  }
  func.func @transform_1(%arg0: i32, %arg1: i32) -> (i32, i32) {
    %c0_i32 = arith.constant 0 : i32
    %c0_i32_0 = arith.constant 0 : i32
    %c0_i32_1 = arith.constant 0 : i32
    return %c0_i32, %c0_i32_0 : i32, i32
  }
  func.func @transform_2(%arg0: i32, %arg1: i32) -> (i32, i32) {
    %c0_i32 = arith.constant 0 : i32
    %c0_i32_0 = arith.constant 0 : i32
    %c0_i32_1 = arith.constant 0 : i32
    return %c0_i32, %c0_i32_0 : i32, i32
  }
  func.func @transform_3(%arg0: i32, %arg1: i32) -> (i32, i32, i32, i32) {
    %c0_i32 = arith.constant 0 : i32
    %c0_i32_0 = arith.constant 0 : i32
    %c0_i32_1 = arith.constant 0 : i32
    return %arg0, %arg1, %c0_i32, %c0_i32_0 : i32, i32, i32, i32
  }
}

</mosaic_0001>

<bundles_post_ra>
// kernel: basic_stem_forward.1
= control target key start
LH: loop header
LB: loop body
LE: loop exit
PB: predicated region body
PF: predicated region fallthrough
CT: control target
= control target key end

     0   :  { %s865_s12 = smov 0   ;;  %s867_s13 = smov 0   ;;  %s1000_s0 = inlined_call_operand.vmem [shape: bf16[2,4,32,147], index: 0, kind: input, shape index: {}]   ;;  %s1001_s1 = inlined_call_operand.vmem [shape: bf16[147,64], index: 1, kind: input, shape index: {}]   ;;  %s1002_s2 = inlined_call_operand.vmem [shape: f32[1,64], index: 2, kind: input, shape index: {}]   ;;  %s1003_s3 = inlined_call_operand.vmem [shape: f32[2,4,8,64], index: 3, kind: output, shape index: {}]  }
   0x1   :  { %s869_s14 = smov 0  }
   0x2 LB: > { %s25_s15 = sadd.s32 1, %s836_s13  ;;  %p693_p0 = scmp.ge.s32.totalorder %s840_s14, 1  ;;  %s840_s14 = sphi %s869_s14, %s13_s14   ;;  %s836_s13 = sphi %s867_s13, %s1005_s13   ;;  %s832_s12 = sphi %s865_s12, %s1004_s12  }
   0x3   : > { %p27_p1 = scmp.ge.s32.totalorder %s25_s15, 2  ;;  %p159_p2 = scmp.lt.s32.totalorder %s840_s14, 3 }
   0x5   : > { %s1007_s15 = smov (%p27_p1, %s25_s15), 0  ;;  %p160_p3 = pnand %p693_p0, %p159_p2 }
   0x6   : > { %v784_v0 = vld [vmem:[%s1001_s1] sm:$0xff] (!%p160_p3)   ;;  %v842_v1 = vmov (!%p160_p3), 0   ;;  %v785_v2 = vld [vmem:[%s1001_s1 + $0x8] sm:$0xff] (!%p160_p3)   ;;  %v786_v3 = vld [vmem:[%s1001_s1 + $0x10] sm:$0xff] (!%p160_p3)   ;;  %p193_p4 = scmp.lt.s32.totalorder (!%p160_p3), %s832_s12, 1  ;;  %vm391_vm0 = vcmask (!%p160_p3), 154624  }
   0x7   : > { %163 = sbr.rel (%p160_p3) target bundleno = 299 (0x12b), region = 32  ;;  %423 = vmatprep.subr.bf16.mxu0 (!%p160_p3), %v842_v1  ;;  %737 = vmatprep.subr.bf16.mxu1 (!%p160_p3), %v842_v1  ;;  %v787_v4 = vld [vmem:[%s1001_s1 + $0x18] sm:$0xff] (!%p160_p3)   ;;  %v788_v6 = vld [vmem:[%s1001_s1 + $0x20] sm:$0xff] (!%p160_p3)   ;;  %v789_v8 = vld [vmem:[%s1001_s1 + $0x28] sm:$0xff] (!%p160_p3)   ;;  %vm416_vm1 = vcmask (!%p160_p3), 1040384   ;;  %vm417_vm2 = vcmask (!%p160_p3), 1041408  }
   0x8   : > { %424 = vmatpush1.bf16.msra.mxu0 (!%p160_p3), %v784_v0  ;;  %747 = vmatpush1.bf16.msra.mxu1 (!%p160_p3), %v784_v0  ;;  %v790_v9 = vld [vmem:[%s1001_s1 + $0x30] sm:$0xff] (!%p160_p3)   ;;  %v791_v10 = vld [vmem:[%s1001_s1 + $0x38] sm:$0xff] (!%p160_p3)   ;;  %v843_v11 = vmov (!%p160_p3), 65535   ;;  %v792_v13 = vld [vmem:[%s1001_s1 + $0x40] sm:$0xff] (!%p160_p3)   ;;  %vm218_vm3 = vcmask (!%p160_p3), 523264   ;;  %v844_v31 = vmov (!%p160_p3), 0.0  }
   0x9   : > { %425 = vmatprep.subr.bf16.mxu0 (!%p160_p3), %v842_v1  ;;  %738 = vmatprep.subr.bf16.mxu1 (!%p160_p3), %v842_v1  ;;  %v418_v12 = vsel (!%p160_p3), %vm416_vm1, 4294967295, %v843_v11  ;;  %v793_v14 = vld [vmem:[%s1001_s1 + $0x48] ss:$0 sps:$4 sm:$0x33] (!%p160_p3)   ;;  %219 = vst.msk [vmem:[#allocation2] sm:$0xff] (!%p160_p3), %vm218_vm3, %v844_v31 }
   0xa   : > { %v419_v15 = vsel (!%p160_p3), %vm417_vm2, %v418_v12, 0  ;;  %v950_v32 = vld [vmem:[%s1002_s2] ss:$0 sm:$0xff] (!%p160_p3) }
   0xb   : > { %v421_v16 = vand.u32 (!%p160_p3), %v793_v14, %v419_v15 }
   0xc   : > { %426 = vmatpush1.bf16.msra.mxu0 (!%p160_p3), %v785_v2  ;;  %748 = vmatpush1.bf16.msra.mxu1 (!%p160_p3), %v785_v2 }
   0xd   : > { %427 = vmatprep.subr.bf16.mxu0 (!%p160_p3), %v842_v1  ;;  %739 = vmatprep.subr.bf16.mxu1 (!%p160_p3), %v842_v1 }
   0xe   : > { %s1009_s12 = smov (!%p193_p4, %s832_s12), 1 }
   0xf   : > { %s735_s24 = sshll.u32 %s1009_s12, 7  ;;  %s736_s19 = sshll.u32 %s1009_s12, 5 }
  0x10   : > { %428 = vmatpush1.bf16.msra.mxu0 %v786_v3  ;;  %749 = vmatpush1.bf16.msra.mxu1 %v786_v3  ;;  %s901_s27 = scalar_lea.vmem %s1000_s0, %s735_s24  ;;  %s972_s22 = scalar_lea.vmem %s1003_s3, %s736_s19 }
  0x11   : > { %429 = vmatprep.subr.bf16.mxu0 %v842_v1  ;;  %740 = vmatprep.subr.bf16.mxu1 %v842_v1  ;;  %v796_v5 = vld [vmem:[%s901_s27 + $0x4] ss:$8 sps:$4 sm:$0xff]   ;;  %v794_v17 = vld [vmem:[%s901_s27] ss:$8 sps:$4 sm:$0xff]   ;;  %v800_v19 = vld [vmem:[%s901_s27 + $0x14] ss:$8 sps:$4 sm:$0xff]  }
  0x12   : > { %v799_v7 = vld [vmem:[%s901_s27 + $0x44] ss:$8 sps:$4 sm:$0xff]   ;;  %725 = vmatprep.mubr.msk.bf16.mxu0 %vm391_vm0, %v796_v5  ;;  %v797_v18 = vld [vmem:[%s901_s27 + $0x40] ss:$8 sps:$4 sm:$0xff]   ;;  %v802_v20 = vld [vmem:[%s901_s27 + $0x54] ss:$8 sps:$4 sm:$0xff]  }
  0x13   : > { %729 = vmatprep.mubr.msk.bf16.mxu1 %vm391_vm0, %v799_v7  ;;  %v804_v21 = vld [vmem:[%s901_s27 + $0x10] ss:$8 sps:$4 sm:$0xff]   ;;  %v806_v23 = vld [vmem:[%s901_s27 + $0x24] ss:$8 sps:$4 sm:$0xff]   ;;  %v810_v25 = vld [vmem:[%s901_s27 + $0x20] ss:$8 sps:$4 sm:$0xff]  }
  0x14   : > { %430 = vmatpush1.bf16.msra.mxu0 %v787_v4  ;;  %750 = vmatpush1.bf16.msra.mxu1 %v787_v4  ;;  %v805_v22 = vld [vmem:[%s901_s27 + $0x50] ss:$8 sps:$4 sm:$0xff]   ;;  %v808_v24 = vld [vmem:[%s901_s27 + $0x64] ss:$8 sps:$4 sm:$0xff]   ;;  %v811_v26 = vld [vmem:[%s901_s27 + $0x60] ss:$8 sps:$4 sm:$0xff]  }
  0x15   : > { %431 = vmatprep.subr.bf16.mxu0 %v842_v1  ;;  %741 = vmatprep.subr.bf16.mxu1 %v842_v1  ;;  %v812_v27 = vld [vmem:[%s901_s27 + $0x34] ss:$8 sps:$4 sm:$0xff]   ;;  %v816_v29 = vld [vmem:[%s901_s27 + $0x30] ss:$8 sps:$4 sm:$0xff]  }
  0x16   : > { %v814_v28 = vld [vmem:[%s901_s27 + $0x74] ss:$8 sps:$4 sm:$0xff]   ;;  %v817_v30 = vld [vmem:[%s901_s27 + $0x70] ss:$8 sps:$4 sm:$0xff]  }
  0x18   : > { %432 = vmatpush1.bf16.msra.mxu0 %v788_v6  ;;  %751 = vmatpush1.bf16.msra.mxu1 %v788_v6 }
  0x19   : > { %433 = vmatprep.subr.bf16.mxu0 %v842_v1  ;;  %742 = vmatprep.subr.bf16.mxu1 %v842_v1 }
  0x1c   : > { %434 = vmatpush1.bf16.msra.mxu0 %v789_v8  ;;  %752 = vmatpush1.bf16.msra.mxu1 %v789_v8 }
  0x1d   : > { %435 = vmatprep.subr.bf16.mxu0 %v842_v1  ;;  %743 = vmatprep.subr.bf16.mxu1 %v842_v1 }
  0x20   : > { %436 = vmatpush1.bf16.msra.mxu0 %v790_v9  ;;  %753 = vmatpush1.bf16.msra.mxu1 %v790_v9 }
  0x21   : > { %437 = vmatprep.subr.bf16.mxu0 %v842_v1  ;;  %744 = vmatprep.subr.bf16.mxu1 %v842_v1 }
  0x24   : > { %438 = vmatpush1.bf16.msra.mxu0 %v791_v10  ;;  %754 = vmatpush1.bf16.msra.mxu1 %v791_v10 }
  0x25   : > { %439 = vmatprep.subr.bf16.mxu0 %v842_v1  ;;  %745 = vmatprep.subr.bf16.mxu1 %v842_v1 }
  0x28   : > { %440 = vmatpush1.bf16.msra.mxu0 %v792_v13  ;;  %755 = vmatpush1.bf16.msra.mxu1 %v792_v13 }
  0x29   : > { %441 = vmatprep.subr.bf16.mxu0 %v842_v1  ;;  %746 = vmatprep.subr.bf16.mxu1 %v842_v1 }
  0x2c   : > { %442 = vmatpush1.bf16.msra.mxu0 %v421_v16  ;;  %756 = vmatpush1.bf16.msra.mxu1 %v421_v16 }
  0x2f   : > { %456 = vmatmul.mubr.bf16.vlgmr.msra.gmra.mrb[0].mxu0 %v794_v17  ;;  %488 = vmatmul.mubr.bf16.vlgmr.msra.gmra.mrb[0].mxu1 %v797_v18 }
  0x30   : > { %726 = vmatprep.mubr.msk.bf16.mxu0 %vm391_vm0, %v800_v19  ;;  %730 = vmatprep.mubr.msk.bf16.mxu1 %vm391_vm0, %v802_v20 }
  0x37   : > { %464 = vmatmul.mubr.bf16.gmra.mrb[4].mxu0 %v804_v21  ;;  %496 = vmatmul.mubr.bf16.gmra.mrb[4].mxu1 %v805_v22 }
  0x38   : > { %727 = vmatprep.mubr.msk.bf16.mxu0 %vm391_vm0, %v806_v23  ;;  %731 = vmatprep.mubr.msk.bf16.mxu1 %vm391_vm0, %v808_v24 }
  0x3f   : > { %472 = vmatmul.mubr.bf16.gmra.mrb[8].mxu0 %v810_v25  ;;  %504 = vmatmul.mubr.bf16.gmra.mrb[8].mxu1 %v811_v26  ;;  %v584_v25 = vld [vmem:[#allocation2] sm:$0xff] }
  0x40   : > { %728 = vmatprep.mubr.msk.bf16.mxu0 %vm391_vm0, %v812_v27  ;;  %732 = vmatprep.mubr.msk.bf16.mxu1 %vm391_vm0, %v814_v28 }
  0x47   : > { %480 = vmatmul.mubr.bf16.gmra.mrb[12].mxu0 %v816_v29  ;;  %512 = vmatmul.mubr.bf16.gmra.mrb[12].mxu1 %v817_v30 }
 0x102   : > { %v457_v33 = vpop.f32.mrb[0].mxu0  ;;  %v489_v34 = vpop.f32.mrb[0].mxu1 }
 0x103   : > { %v458_v35 = vadd.f32 %v950_v32, %v457_v33  ;;  %v490_v36 = vadd.f32 %v950_v32, %v489_v34  ;;  %v459_v37 = vpop.f32.mrb[1].mxu0  ;;  %v491_v38 = vpop.f32.mrb[1].mxu1 }
 0x104   : > { %v460_v39 = vpop.f32.mrb[2].mxu0  ;;  %v492_v40 = vpop.f32.mrb[2].mxu1 }
 0x105   : > { %v461_v41 = vadd.f32 %v950_v32, %v460_v39  ;;  %v493_v42 = vadd.f32 %v950_v32, %v492_v40  ;;  %v462_v43 = vpop.f32.mrb[3].mxu0  ;;  %v494_v44 = vpop.f32.mrb[3].mxu1  ;;  %v520_v45 = vmax.f32 %v458_v35, 0.0  ;;  %v528_v46 = vmax.f32 %v490_v36, 0.0 }
 0x107   : > { %v521_v47 = vmax.f32 %v461_v41, 0.0  ;;  %v529_v48 = vmax.f32 %v493_v42, 0.0 }
 0x109   : > { %v544_v49 = vrot.slane %v521_v47, 7  ;;  %v568_v50 = vmax.f32 %v520_v45, %v521_v47  ;;  %v548_v51 = vrot.slane %v529_v48, 7  ;;  %v572_v52 = vmax.f32 %v528_v46, %v529_v48 }
 0x10a   : > { %v465_v53 = vpop.f32.mrb[4].mxu0  ;;  %v497_v54 = vpop.f32.mrb[4].mxu1 }
 0x10b   : > { %v560_v55 = vsel %vm416_vm1, 0.0, %v544_v49  ;;  %v564_v56 = vsel %vm416_vm1, 0.0, %v548_v51  ;;  %v466_v57 = vadd.f32 %v950_v32, %v465_v53  ;;  %v498_v58 = vadd.f32 %v950_v32, %v497_v54  ;;  %v467_v59 = vpop.f32.mrb[5].mxu0  ;;  %v499_v60 = vpop.f32.mrb[5].mxu1 }
 0x10c   : > { %v576_v61 = vmax.f32 %v568_v50, %v560_v55  ;;  %v580_v62 = vmax.f32 %v572_v52, %v564_v56  ;;  %v468_v63 = vpop.f32.mrb[6].mxu0  ;;  %v500_v0 = vpop.f32.mrb[6].mxu1 }
 0x10d   : > { %v469_v1 = vadd.f32 %v950_v32, %v468_v63  ;;  %v501_v2 = vadd.f32 %v950_v32, %v500_v0  ;;  %v470_v3 = vpop.f32.mrb[7].mxu0  ;;  %v502_v4 = vpop.f32.mrb[7].mxu1  ;;  %v522_v5 = vmax.f32 %v466_v57, 0.0  ;;  %v530_v6 = vmax.f32 %v498_v58, 0.0 }
 0x10f   : > { %v523_v7 = vmax.f32 %v469_v1, 0.0  ;;  %v531_v8 = vmax.f32 %v501_v2, 0.0 }
 0x111   : > { %v545_v9 = vrot.slane %v523_v7, 7  ;;  %v569_v10 = vmax.f32 %v522_v5, %v523_v7  ;;  %v549_v11 = vrot.slane %v531_v8, 7  ;;  %v573_v12 = vmax.f32 %v530_v6, %v531_v8 }
 0x112   : > { %v473_v13 = vpop.f32.mrb[8].mxu0  ;;  %v505_v14 = vpop.f32.mrb[8].mxu1 }
 0x113   : > { %v561_v15 = vsel %vm416_vm1, 0.0, %v545_v9  ;;  %v565_v16 = vsel %vm416_vm1, 0.0, %v549_v11  ;;  %v474_v17 = vadd.f32 %v950_v32, %v473_v13  ;;  %v506_v18 = vadd.f32 %v950_v32, %v505_v14  ;;  %v475_v19 = vpop.f32.mrb[9].mxu0  ;;  %v507_v20 = vpop.f32.mrb[9].mxu1 }
 0x114   : > { %v577_v21 = vmax.f32 %v569_v10, %v561_v15  ;;  %v581_v22 = vmax.f32 %v573_v12, %v565_v16  ;;  %v476_v23 = vpop.f32.mrb[10].mxu0  ;;  %v508_v24 = vpop.f32.mrb[10].mxu1 }
 0x115   : > { %v477_v26 = vadd.f32 %v950_v32, %v476_v23  ;;  %v509_v27 = vadd.f32 %v950_v32, %v508_v24  ;;  %v478_v28 = vpop.f32.mrb[11].mxu0  ;;  %v510_v29 = vpop.f32.mrb[11].mxu1  ;;  %v524_v33 = vmax.f32 %v474_v17, 0.0  ;;  %v532_v34 = vmax.f32 %v506_v18, 0.0 }
 0x116   : > { %v585_v30 = vmax.f32 %v576_v61, %v577_v21  ;;  %v587_v31 = vmax.f32 %v580_v62, %v581_v22 }
 0x117   : > { %v525_v35 = vmax.f32 %v477_v26, 0.0  ;;  %v533_v36 = vmax.f32 %v509_v27, 0.0 }
 0x118   : > { %v589_v37 = vmax.f32 %v585_v30, %v584_v25 }
 0x119   : > { %v546_v38 = vrot.slane %v525_v35, 7  ;;  %v570_v39 = vmax.f32 %v524_v33, %v525_v35  ;;  %v550_v40 = vrot.slane %v533_v36, 7  ;;  %v574_v41 = vmax.f32 %v532_v34, %v533_v36 }
 0x11a   : > { %594 = vst.msk [vmem:[%s972_s22] sm:$0xff] %vm218_vm3, %v589_v37  ;;  %v481_v42 = vpop.f32.mrb[12].mxu0  ;;  %v513_v43 = vpop.f32.mrb[12].mxu1 }
 0x11b   : > { %v562_v44 = vsel %vm416_vm1, 0.0, %v546_v38  ;;  %v566_v45 = vsel %vm416_vm1, 0.0, %v550_v40  ;;  %v482_v46 = vadd.f32 %v950_v32, %v481_v42  ;;  %v514_v47 = vadd.f32 %v950_v32, %v513_v43  ;;  %v483_v48 = vpop.f32.mrb[13].mxu0  ;;  %v515_v49 = vpop.f32.mrb[13].mxu1 }
 0x11c   : > { %v578_v50 = vmax.f32 %v570_v39, %v562_v44  ;;  %v582_v51 = vmax.f32 %v574_v41, %v566_v45  ;;  %v484_v52 = vpop.f32.mrb[14].mxu0  ;;  %v516_v53 = vpop.f32.mrb[14].mxu1 }
 0x11d   : > { %v485_v54 = vadd.f32 %v950_v32, %v484_v52  ;;  %v517_v55 = vadd.f32 %v950_v32, %v516_v53  ;;  %v486_v56 = vpop.f32.mrb[15].mxu0  ;;  %v518_v57 = vpop.f32.mrb[15].mxu1  ;;  %v526_v58 = vmax.f32 %v482_v46, 0.0  ;;  %v534_v59 = vmax.f32 %v514_v47, 0.0 }
 0x11f   : > { %v527_v60 = vmax.f32 %v485_v54, 0.0  ;;  %v535_v61 = vmax.f32 %v517_v55, 0.0 }
 0x121   : > { %v547_v62 = vrot.slane %v527_v60, 7  ;;  %v571_v63 = vmax.f32 %v526_v58, %v527_v60  ;;  %v551_v0 = vrot.slane %v535_v61, 7  ;;  %v575_v1 = vmax.f32 %v534_v59, %v535_v61 }
 0x123   : > { %v563_v2 = vsel %vm416_vm1, 0.0, %v547_v62  ;;  %v567_v3 = vsel %vm416_vm1, 0.0, %v551_v0 }
 0x124   : > { %v579_v4 = vmax.f32 %v571_v63, %v563_v2  ;;  %v583_v5 = vmax.f32 %v575_v1, %v567_v3 }
 0x126   : > { %v586_v32 = vmax.f32 %v578_v50, %v579_v4  ;;  %v591_v6 = vmax.f32 %v587_v31, %v579_v4  ;;  %v588_v7 = vmax.f32 %v582_v51, %v583_v5  ;;  %598 = vst.msk [vmem:[#allocation2] sm:$0xff] %vm218_vm3, %v583_v5 }
 0x128   : > { %v590_v8 = vmax.f32 %v586_v32, %v577_v21  ;;  %596 = vst.msk [vmem:[%s972_s22 + $0x10] sm:$0xff] %vm218_vm3, %v591_v6  ;;  %v592_v9 = vmax.f32 %v588_v7, %v581_v22 }
 0x12a   : > { %595 = vst.msk [vmem:[%s972_s22 + $0x8] sm:$0xff] %vm218_vm3, %v590_v8  ;;  %597 = vst.msk [vmem:[%s972_s22 + $0x18] sm:$0xff] %vm218_vm3, %v592_v9 }
 0x12b PF: > { %s13_s14 = sadd.s32 1, %s840_s14   ;;  %s1004_s12 = smov %s836_s13 }
 0x12c   : > { %p10_p5 = scmp.ge.s32.totalorder %s13_s14, 4   ;;  %s1005_s13 = smov %s1007_s15 }
 0x12e   :  { %12 = sbr.rel (!%p10_p5) target bundleno = 2 (0x2), region = 66 }

</bundles_post_ra>
